<compile_context>
chip_gen: v7x
topology: tpu7x:2x2x1
jax: 0.10.0
libtpu: 0.0.40
codegen_flags: <defaults>
</compile_context>

<pallas_src>
import functools
import math

import jax
import jax.numpy as jnp
from jax import lax
from jax.experimental import pallas as pl
from jax.experimental.pallas import tpu as pltpu

LN_EPS = 1e-5
LANE = 128
INTER_CHUNK = 512               # c_inter chunk width when the intermediate dim is tiled
INTER_CHUNK_THRESHOLD = 1024    # chunk the intermediate dim above this width


def _round_up(x, m):
    return (x + m - 1) // m * m


def _sublane_min(dtype):
    # (8,128) f32 tile minimum; (16,128) for 2-byte dtypes (bf16).
    return 16 if jnp.dtype(dtype).itemsize == 2 else 8


def _vmem_capacity_bytes():
    try:
        return int(pltpu.get_tpu_info().vmem_capacity_bytes)
    except Exception:
        return 64 * 1024 * 1024  # conservative fallback (v7x per-TC VMEM)


def _transition_kernel(x_ref, gamma_ref, beta_ref, w1_ref, b1_ref, w2_ref, b2_ref,
                       o_ref, *, c_in, n_chunks, chunk):
    # x_ref: (row_tile, c_in) -- no padded channel lanes, so LN stats need no masking.
    x = x_ref[...].astype(jnp.float32)

    # --- LayerNorm statistics in f32 ---
    mean = jnp.sum(x, axis=-1, keepdims=True) * (1.0 / c_in)
    xc = x - mean
    var = jnp.sum(xc * xc, axis=-1, keepdims=True) * (1.0 / c_in)
    inv = lax.rsqrt(var + LN_EPS)
    xn = xc * inv * gamma_ref[...].astype(jnp.float32) + beta_ref[...].astype(jnp.float32)

    w_dtype = w1_ref.dtype
    xn_mxu = xn.astype(w_dtype)          # MXU operands in the weight dtype
    b2 = b2_ref[...].astype(jnp.float32)

    def one_chunk(off):
        w1c = w1_ref[:, pl.ds(off, chunk)]
        b1c = b1_ref[:, pl.ds(off, chunk)].astype(jnp.float32)
        h = jnp.dot(xn_mxu, w1c, preferred_element_type=jnp.float32)
        h = jnp.maximum(h + b1c, 0.0)
        w2c = w2_ref[pl.ds(off, chunk), :]
        return jnp.dot(h.astype(w_dtype), w2c, preferred_element_type=jnp.float32)

    if n_chunks == 1:
        y = one_chunk(0) + b2
    else:
        def body(c, acc):
            off = pl.multiple_of(c * chunk, chunk)
            return acc + one_chunk(off)
        y = lax.fori_loop(0, n_chunks, body, jnp.zeros(o_ref.shape, jnp.float32)) + b2

    o_ref[...] = y.astype(o_ref.dtype)


def make_transition(params, *, mxu_dtype=None, row_tile=None):
    """Build a fused, jitted Transition forward matching the PyTorch module.

    Weights / LN parameters are padded and (optionally) cast exactly once here.
    The returned fn(act, mask=None) ignores `mask` -- exactly like the reference
    forward(); callers expecting masked LayerNorm will get different results.
    """
    gamma = jnp.asarray(params["ln_gamma"])
    beta = jnp.asarray(params["ln_beta"])
    w1 = jnp.asarray(params["w_in"])
    b1 = jnp.asarray(params["b_in"])
    w2 = jnp.asarray(params["w_out"])
    b2 = jnp.asarray(params["b_out"])
    if mxu_dtype is not None:
        w1, b1, w2, b2 = (a.astype(mxu_dtype) for a in (w1, b1, w2, b2))

    c_in, c_inter = w1.shape
    c_out = w2.shape[1]

    # Pad only the intermediate (contraction) dim of the weights, once.
    if c_inter > INTER_CHUNK_THRESHOLD:
        c_inter_p = _round_up(c_inter, INTER_CHUNK)
        chunk = INTER_CHUNK
    else:
        c_inter_p = _round_up(c_inter, LANE)
        chunk = c_inter_p
    n_chunks = c_inter_p // chunk

    w1p = jnp.pad(w1, ((0, 0), (0, c_inter_p - c_inter)))
    b1p = jnp.pad(b1.reshape(1, c_inter), ((0, 0), (0, c_inter_p - c_inter)))
    w2p = jnp.pad(w2, ((0, c_inter_p - c_inter), (0, 0)))
    b2p = b2.reshape(1, c_out)
    gamma2d = gamma.reshape(1, c_in)
    beta2d = beta.reshape(1, c_in)

    kernel = functools.partial(_transition_kernel, c_in=c_in,
                               n_chunks=n_chunks, chunk=chunk)

    vmem_cap = _vmem_capacity_bytes()
    vmem_budget = int(vmem_cap * 0.75)
    w_bytes = jnp.dtype(w1p.dtype).itemsize
    # Grid-invariant blocks (weights/biases/LN params); assume double-buffered.
    const_bytes = 2 * w_bytes * (c_in * c_inter_p + c_inter_p * c_out
                                 + 2 * c_in + c_inter_p + c_out)
    # TODO(synk): weights too large to stay resident in VMEM would need an extra grid
    # axis over c_inter/c_out; not needed for Transition-sized channels.

    def _pick_row_tile(m_rows, act_dtype):
        sub = _sublane_min(act_dtype)
        if row_tile is not None:
            return max(sub, _round_up(int(row_tile), sub))
        act_bytes = jnp.dtype(act_dtype).itemsize
        # 512-wide row tiles on 128 MiB VMEM parts (v5e/v6e), 256 on v7x (64 MiB).
        target = 256 if vmem_cap <= 96 * 1024 * 1024 else 512
        # Guarantee >= 2 grid steps when M allows so the "parallel" row axis can
        # actually shard across v7x's 2 TensorCores.
        target = min(target, max(sub, _round_up(-(-m_rows // 2), sub)))
        tile = max(sub, _round_up(target, sub))
        while tile > sub:
            per_step = (2 * act_bytes * tile * c_in        # x, double-buffered
                        + 2 * act_bytes * tile * c_out     # out, double-buffered
                        + 4 * tile * (c_in + chunk + c_out))  # f32 xn / h-chunk / acc
            if const_bytes + per_step <= vmem_budget:
                break
            tile = max(sub, _round_up(tile // 2, sub))
        return tile

    @jax.jit
    def _forward_impl(act, gamma2d, beta2d, w1p, b1p, w2p, b2p):
        lead = act.shape[:-1]
        m_rows = math.prod(lead) if lead else 1
        x2d = act.reshape(m_rows, c_in)
        tile = _pick_row_tile(m_rows, act.dtype)

        out2d = pl.pallas_call(
            kernel,
            out_shape=jax.ShapeDtypeStruct((m_rows, c_out), act.dtype),
            grid_spec=pltpu.PrefetchScalarGridSpec(
                num_scalar_prefetch=0,
                grid=(pl.cdiv(m_rows, tile),),
                in_specs=[
                    pl.BlockSpec((tile, c_in), lambda i: (i, 0)),          # act rows
                    pl.BlockSpec((1, c_in), lambda i: (0, 0)),             # gamma
                    pl.BlockSpec((1, c_in), lambda i: (0, 0)),             # beta
                    pl.BlockSpec((c_in, c_inter_p), lambda i: (0, 0)),     # w_in
                    pl.BlockSpec((1, c_inter_p), lambda i: (0, 0)),        # b_in
                    pl.BlockSpec((c_inter_p, c_out), lambda i: (0, 0)),    # w_out
                    pl.BlockSpec((1, c_out), lambda i: (0, 0)),            # b_out
                ],
                out_specs=pl.BlockSpec((tile, c_out), lambda i: (i, 0)),
            ),
            compiler_params=pltpu.CompilerParams(
                dimension_semantics=("parallel",),   # rows shard across v7x's 2 TCs
                vmem_limit_bytes=vmem_budget,
            ),
        )(x2d, gamma2d, beta2d, w1p, b1p, w2p, b2p)

        return out2d.reshape(*lead, c_out)

    def forward(act, mask=None):
        del mask  # unused by the reference forward()
        return _forward_impl(act, gamma2d, beta2d, w1p, b1p, w2p, b2p)

    return forward


def init_params(key, c_in, factor, c_out, dtype=jnp.float32):
    c_inter = c_in * factor
    k1, k2 = jax.random.split(key)
    ln_gamma = jnp.ones((c_in,), dtype)
    ln_beta = jnp.zeros((c_in,), dtype)
    # proj_in: init='linear' (lecun-normal-ish). proj_out: init='final' is zeros in the
    # reference -- use a tiny deterministic non-zero init so the output is non-trivial.
    w_in = (jax.random.normal(k1, (c_in, c_inter), jnp.float32) /
            jnp.sqrt(float(c_in))).astype(dtype)
    b_in = jnp.zeros((c_inter,), dtype)
    w_out = (jax.random.normal(k2, (c_inter, c_out), jnp.float32) * 0.02).astype(dtype)
    b_out = jnp.zeros((c_out,), dtype)
    return dict(ln_gamma=ln_gamma, ln_beta=ln_beta,
                w_in=w_in, b_in=b_in, w_out=w_out, b_out=b_out)


def transition_ref(act, params):
    x = act.astype(jnp.float32)
    mean = jnp.mean(x, axis=-1, keepdims=True)
    var = jnp.mean((x - mean) ** 2, axis=-1, keepdims=True)
    xn = (x - mean) * lax.rsqrt(var + LN_EPS)
    xn = xn * params["ln_gamma"].astype(jnp.float32) + params["ln_beta"].astype(jnp.float32)
    h = jnp.maximum(
        jnp.dot(xn, params["w_in"].astype(jnp.float32), precision=lax.Precision.HIGHEST)
        + params["b_in"].astype(jnp.float32), 0.0)
    return (jnp.dot(h, params["w_out"].astype(jnp.float32), precision=lax.Precision.HIGHEST)
            + params["b_out"].astype(jnp.float32))


if __name__ == "__main__":
    key = jax.random.PRNGKey(0)
    k_act, k_par, k_act2, k_par2 = jax.random.split(key, 4)

    # Small config (module defaults: num_intermediate_factor=4, out channels = in).
    batch, seq, c_in = 2, 8, 32
    factor, c_out = 4, 32

    act = jax.random.normal(k_act, (batch, seq, c_in), jnp.float32)
    mask = jnp.ones((batch, seq), jnp.float32)  # unused by forward(), kept for parity
    params = init_params(k_par, c_in, factor, c_out, dtype=jnp.float32)

    # f32 weights: exact path, tight tolerance.
    fwd = make_transition(params)
    out = jax.block_until_ready(fwd(act, mask))
    ref = transition_ref(act, params)
    assert out.shape == (batch, seq, c_out)
    assert jnp.allclose(out, ref, atol=1e-4, rtol=1e-4), "f32 mismatch vs reference"

    # bf16 weights/activations: MXU fast path (f32 accumulation), looser tolerance.
    params_bf = {k: v.astype(jnp.bfloat16) for k, v in params.items()}
    fwd_bf = make_transition(params_bf)
    out_bf = jax.block_until_ready(fwd_bf(act.astype(jnp.bfloat16), mask))
    assert jnp.allclose(out_bf.astype(jnp.float32), ref, atol=5e-2, rtol=5e-2), \
        "bf16 mismatch vs reference"

    # Larger intermediate dim: exercises the chunked (fori_loop) c_inter path.
    c_in2, factor2 = 128, 16  # c_inter = 2048 > chunk threshold
    act2 = jax.random.normal(k_act2, (2, 16, c_in2), jnp.float32)
    params2 = init_params(k_par2, c_in2, factor2, c_in2, dtype=jnp.float32)
    fwd2 = make_transition(params2)
    out2 = jax.block_until_ready(fwd2(act2, None))
    ref2 = transition_ref(act2, params2)
    assert jnp.allclose(out2, ref2, atol=1e-3, rtol=1e-3), "chunked-path mismatch"

    print("KERNEL_OK")
</pallas_src>

<mosaic_0001>
module attributes {stable_mosaic.version = 11 : i64} {
  func.func @_transition_kernel(%arg0: i32, %arg1: memref<8x32xf32, #tpu.memory_space<vmem>>, %arg2: memref<1x32xf32, #tpu.memory_space<vmem>>, %arg3: memref<1x32xf32, #tpu.memory_space<vmem>>, %arg4: memref<32x128xf32, #tpu.memory_space<vmem>>, %arg5: memref<1x128xf32, #tpu.memory_space<vmem>>, %arg6: memref<128x32xf32, #tpu.memory_space<vmem>>, %arg7: memref<1x32xf32, #tpu.memory_space<vmem>>, %arg8: memref<8x32xf32, #tpu.memory_space<vmem>>) attributes {dimension_semantics = [#tpu.dimension_semantics<parallel>], iteration_bounds = array<i64: 2>, scalar_prefetch = 0 : i64, scratch_operands = 0 : i64, tpu.core_type = #tpu.core_type<tc>, window_params = [{transform_indices = @transform_0, window_bounds = array<i64: 8, 32>}, {pipeline_mode = #tpu.pipeline_mode<synchronous>, transform_indices = @transform_1, window_bounds = array<i64: 1, 32>}, {pipeline_mode = #tpu.pipeline_mode<synchronous>, transform_indices = @transform_2, window_bounds = array<i64: 1, 32>}, {pipeline_mode = #tpu.pipeline_mode<synchronous>, transform_indices = @transform_3, window_bounds = array<i64: 32, 128>}, {pipeline_mode = #tpu.pipeline_mode<synchronous>, transform_indices = @transform_4, window_bounds = array<i64: 1, 128>}, {pipeline_mode = #tpu.pipeline_mode<synchronous>, transform_indices = @transform_5, window_bounds = array<i64: 128, 32>}, {pipeline_mode = #tpu.pipeline_mode<synchronous>, transform_indices = @transform_6, window_bounds = array<i64: 1, 32>}, {transform_indices = @transform_7, window_bounds = array<i64: 8, 32>}]} {
    %c0 = arith.constant 0 : index
    %c0_0 = arith.constant 0 : index
    %0 = vector.load %arg1[%c0, %c0_0] : memref<8x32xf32, #tpu.memory_space<vmem>>, vector<8x32xf32>
    %cst = arith.constant dense<0.000000e+00> : vector<8xf32>
    %1 = vector.multi_reduction <add>, %0, %cst [1] : vector<8x32xf32> to vector<8xf32>
    %2 = vector.shape_cast %1 : vector<8xf32> to vector<8x1xf32>
    %cst_1 = arith.constant 3.125000e-02 : f32
    %3 = vector.broadcast %cst_1 : f32 to vector<8x1xf32>
    %4 = arith.mulf %2, %3 : vector<8x1xf32>
    %5 = vector.broadcast %4 : vector<8x1xf32> to vector<8x32xf32>
    %6 = arith.subf %0, %5 : vector<8x32xf32>
    %7 = arith.mulf %6, %6 : vector<8x32xf32>
    %cst_2 = arith.constant dense<0.000000e+00> : vector<8xf32>
    %8 = vector.multi_reduction <add>, %7, %cst_2 [1] : vector<8x32xf32> to vector<8xf32>
    %9 = vector.shape_cast %8 : vector<8xf32> to vector<8x1xf32>
    %cst_3 = arith.constant 3.125000e-02 : f32
    %10 = vector.broadcast %cst_3 : f32 to vector<8x1xf32>
    %11 = arith.mulf %9, %10 : vector<8x1xf32>
    %cst_4 = arith.constant 9.99999974E-6 : f32
    %12 = vector.broadcast %cst_4 : f32 to vector<8x1xf32>
    %13 = arith.addf %11, %12 : vector<8x1xf32>
    %14 = math.rsqrt %13 : vector<8x1xf32>
    %15 = vector.broadcast %14 : vector<8x1xf32> to vector<8x32xf32>
    %16 = arith.mulf %6, %15 : vector<8x32xf32>
    %c0_5 = arith.constant 0 : index
    %c0_6 = arith.constant 0 : index
    %17 = vector.load %arg2[%c0_5, %c0_6] : memref<1x32xf32, #tpu.memory_space<vmem>>, vector<1x32xf32>
    %18 = vector.broadcast %17 : vector<1x32xf32> to vector<8x32xf32>
    %19 = arith.mulf %16, %18 : vector<8x32xf32>
    %c0_7 = arith.constant 0 : index
    %c0_8 = arith.constant 0 : index
    %20 = vector.load %arg3[%c0_7, %c0_8] : memref<1x32xf32, #tpu.memory_space<vmem>>, vector<1x32xf32>
    %21 = vector.broadcast %20 : vector<1x32xf32> to vector<8x32xf32>
    %22 = arith.addf %19, %21 : vector<8x32xf32>
    %c0_9 = arith.constant 0 : index
    %c0_10 = arith.constant 0 : index
    %23 = vector.load %arg7[%c0_9, %c0_10] : memref<1x32xf32, #tpu.memory_space<vmem>>, vector<1x32xf32>
    %c0_11 = arith.constant 0 : index
    %c0_12 = arith.constant 0 : index
    %24 = vector.load %arg4[%c0_11, %c0_12] : memref<32x128xf32, #tpu.memory_space<vmem>>, vector<32x128xf32>
    %c0_13 = arith.constant 0 : index
    %c0_14 = arith.constant 0 : index
    %25 = vector.load %arg5[%c0_13, %c0_14] : memref<1x128xf32, #tpu.memory_space<vmem>>, vector<1x128xf32>
    %cst_15 = arith.constant dense<0.000000e+00> : vector<8x128xf32>
    %26 = tpu.matmul %22, %24, %cst_15 {dimension_numbers = #tpu.dot_dimension_numbers<[1], [0], [0], [1], [0, 0, 1, 1], [], []>} : vector<8x32xf32>, vector<32x128xf32>, vector<8x128xf32> -> vector<8x128xf32>
    %27 = vector.broadcast %25 : vector<1x128xf32> to vector<8x128xf32>
    %28 = arith.addf %26, %27 : vector<8x128xf32>
    %cst_16 = arith.constant 0.000000e+00 : f32
    %29 = vector.broadcast %cst_16 : f32 to vector<8x128xf32>
    %30 = arith.maximumf %28, %29 : vector<8x128xf32>
    %c0_17 = arith.constant 0 : index
    %c0_18 = arith.constant 0 : index
    %31 = vector.load %arg6[%c0_17, %c0_18] : memref<128x32xf32, #tpu.memory_space<vmem>>, vector<128x32xf32>
    %cst_19 = arith.constant dense<0.000000e+00> : vector<8x32xf32>
    %32 = tpu.matmul %30, %31, %cst_19 {dimension_numbers = #tpu.dot_dimension_numbers<[1], [0], [0], [1], [0, 0, 1, 1], [], []>} : vector<8x128xf32>, vector<128x32xf32>, vector<8x32xf32> -> vector<8x32xf32>
    %33 = vector.broadcast %23 : vector<1x32xf32> to vector<8x32xf32>
    %34 = arith.addf %32, %33 : vector<8x32xf32>
    %c0_20 = arith.constant 0 : index
    %c0_21 = arith.constant 0 : index
    %35 = vector.load %arg8[%c0_20, %c0_21] : memref<8x32xf32, #tpu.memory_space<vmem>>, vector<8x32xf32>
    tpu.vector_store %arg8[%c0_20, %c0_21], %34 {strides = array<i32>} : memref<8x32xf32, #tpu.memory_space<vmem>>, vector<8x32xf32>,
    return
  }
  func.func @transform_0(%arg0: i32) -> (i32, i32) {
    %c0_i32 = arith.constant 0 : i32
    %c0_i32_0 = arith.constant 0 : i32
    return %arg0, %c0_i32 : i32, i32
  }
  func.func @transform_1(%arg0: i32) -> (i32, i32) {
    %c0_i32 = arith.constant 0 : i32
    %c0_i32_0 = arith.constant 0 : i32
    %c0_i32_1 = arith.constant 0 : i32
    return %c0_i32, %c0_i32_0 : i32, i32
  }
  func.func @transform_2(%arg0: i32) -> (i32, i32) {
    %c0_i32 = arith.constant 0 : i32
    %c0_i32_0 = arith.constant 0 : i32
    %c0_i32_1 = arith.constant 0 : i32
    return %c0_i32, %c0_i32_0 : i32, i32
  }
  func.func @transform_3(%arg0: i32) -> (i32, i32) {
    %c0_i32 = arith.constant 0 : i32
    %c0_i32_0 = arith.constant 0 : i32
    %c0_i32_1 = arith.constant 0 : i32
    return %c0_i32, %c0_i32_0 : i32, i32
  }
  func.func @transform_4(%arg0: i32) -> (i32, i32) {
    %c0_i32 = arith.constant 0 : i32
    %c0_i32_0 = arith.constant 0 : i32
    %c0_i32_1 = arith.constant 0 : i32
    return %c0_i32, %c0_i32_0 : i32, i32
  }
  func.func @transform_5(%arg0: i32) -> (i32, i32) {
    %c0_i32 = arith.constant 0 : i32
    %c0_i32_0 = arith.constant 0 : i32
    %c0_i32_1 = arith.constant 0 : i32
    return %c0_i32, %c0_i32_0 : i32, i32
  }
  func.func @transform_6(%arg0: i32) -> (i32, i32) {
    %c0_i32 = arith.constant 0 : i32
    %c0_i32_0 = arith.constant 0 : i32
    %c0_i32_1 = arith.constant 0 : i32
    return %c0_i32, %c0_i32_0 : i32, i32
  }
  func.func @transform_7(%arg0: i32) -> (i32, i32) {
    %c0_i32 = arith.constant 0 : i32
    %c0_i32_0 = arith.constant 0 : i32
    return %arg0, %c0_i32 : i32, i32
  }
}

</mosaic_0001>

<bundles_post_ra>
// kernel: _forward_impl.1
= control target key start
LH: loop header
LB: loop body
LE: loop exit
PB: predicated region body
PF: predicated region fallthrough
CT: control target
= control target key end

     0   :  { %12 = vsyncpa [#allocation3], 0  ;;  %s998_s0 = inlined_call_operand.vmem [shape: f32[16,32], index: 0, kind: input, shape index: {}]   ;;  %s999_s1 = inlined_call_operand.vmem [shape: f32[1,32], index: 1, kind: input, shape index: {}]   ;;  %s1000_s2 = inlined_call_operand.vmem [shape: f32[1,32], index: 2, kind: input, shape index: {}]   ;;  %s1001_s3 = inlined_call_operand.vmem [shape: f32[32,128], index: 3, kind: input, shape index: {}]   ;;  %s1002_s4 = inlined_call_operand.vmem [shape: f32[1,128], index: 4, kind: input, shape index: {}]   ;;  %s1003_s5 = inlined_call_operand.vmem [shape: f32[128,32], index: 5, kind: input, shape index: {}]   ;;  %s1004_s6 = inlined_call_operand.vmem [shape: f32[1,32], index: 6, kind: input, shape index: {}]   ;;  %s1005_s7 = inlined_call_operand.hbm [shape: f32[16,32], index: 7, kind: output, shape index: {}]  }
   0x1   :  { %14 = vsyncpa [#allocation3 + $0x1], 0  ;;  %s822_s24 = smov 0   ;;  %s824_s25 = smov 0  }
   0x2   :  { %s826_s26 = smov 0   ;;  %s828_s27 = smov 0  }
   0x3 LB: > { %s843_s28 = sadd.s32 4294967295, %s776_s27   ;;  %s557_s29 = sadd.s32 4294967294, %s776_s27   ;;  %s776_s27 = sphi %s828_s27, %s1011_s27   ;;  %s772_s26 = sphi %s826_s26, %s1010_s26   ;;  %s768_s25 = sphi %s824_s25, %s1009_s25   ;;  %s764_s24 = sphi %s822_s24, %s1008_s24  }
   0x4   : > { %s847_s30 = sadd.s32 1, %s776_s27   ;;  %s179_s8 = sadd.s32 1, %s772_s26 }
   0x5   : > { %s176_s9 = ssub.s32 %s776_s27, %s847_s30  ;;  %p189_p0 = scmp.ne.s32.totalorder %s772_s26, %s768_s25 }
   0x6   : > { %p177_p1 = scmp.eq.s32.totalorder %s176_s9, 0  ;;  %p190_p2 = scmp.eq.s32.totalorder %s843_s28, 1 }
   0x7   : > { %p195_p3 = scmp.ne.s32.totalorder %s768_s25, %s764_s24  ;;  %p196_p4 = scmp.eq.s32.totalorder %s557_s29, 1 }
   0x8   : > { %s858_s10 = scalar_select %p177_p1, %s772_s26, %s179_s8  }
   0x9   : > { %p860_p5 = por %p190_p2, %p189_p0  ;;  %p864_p6 = por %p196_p4, %p195_p3 }
   0xa   : > { %p560_p7 = scmp.ge.s32.totalorder %s776_s27, 1  ;;  %p239_p8 = scmp.lt.s32.totalorder %s776_s27, 3 }
   0xc   : > { %p240_p9 = pnand %p560_p7, %p239_p8 }
   0xd   : > { %p270_p10 = scmp.lt.s32.totalorder (!%p240_p9), %s843_s28, 1  ;;  %vm275_vm0 = vcmask (!%p240_p9), 261120   ;;  %v306_v7 = vld [vmem:[%s1001_s3] sm:$0xff] (!%p240_p9)  ;;  %v307_v8 = vld [vmem:[%s1001_s3 + $0x8] sm:$0xff] (!%p240_p9)  ;;  %v308_v9 = vld [vmem:[%s1001_s3 + $0x10] sm:$0xff] (!%p240_p9)  ;;  %v778_v10 = vmov (!%p240_p9), 0.0|0.0  }
   0xe   : > { %243 = sbr.rel (%p240_p9) target bundleno = 783 (0x30f), region = 48  ;;  %640 = vmatprep.subr.bf16.mxu0 (!%p240_p9), %v778_v10  ;;  %v641_v11 = vpack.c.bf16 (!%p240_p9), %v307_v8, %v306_v7  ;;  %v309_v12 = vld [vmem:[%s1001_s3 + $0x18] sm:$0xff] (!%p240_p9)  ;;  %vm779_vm1 = vmmov (!%p240_p9), 0   ;;  %v780_v13 = vmov (!%p240_p9), 0.0   ;;  %646 = vmatprep.subr.bf16.mxu1 (!%p240_p9), %v778_v10  ;;  %v391_v15 = vld [vmem:[%s1003_s5] sm:$0xff] (!%p240_p9)  ;;  %v392_v16 = vld [vmem:[%s1003_s5 + $0x8] sm:$0xff] (!%p240_p9) }
   0xf   : > { %602 = vmatprep.mubr.msk.f32.mxu0 (!%p240_p9), %vm779_vm1, %v780_v13  ;;  %637 = vmatprep.mubr.msk.f32.mxu1 (!%p240_p9), %vm779_vm1, %v780_v13  ;;  %v644_v14 = vpack.c.bf16 (!%p240_p9), %v309_v12, %v308_v9  ;;  %v393_v17 = vld [vmem:[%s1003_s5 + $0x10] sm:$0xff] (!%p240_p9)  ;;  %v647_v18 = vpack.c.bf16 (!%p240_p9), %v392_v16, %v391_v15  ;;  %v394_v19 = vld [vmem:[%s1003_s5 + $0x18] sm:$0xff] (!%p240_p9)  ;;  %v395_v21 = vld [vmem:[%s1003_s5 + $0x20] sm:$0xff] (!%p240_p9)  ;;  %s267_s22 = sand.u32 (!%p240_p9), 1, %s768_s25   ;;  %s569_s9 = sshll.u32 (!%p240_p9), %s843_s28, 7 }
  0x10   : > { %642 = vmatpush3.bf16.msra.mxu0 (!%p240_p9), %v641_v11  ;;  %v650_v20 = vpack.c.bf16 (!%p240_p9), %v394_v19, %v393_v17  ;;  %v396_v22 = vld [vmem:[%s1003_s5 + $0x28] sm:$0xff] (!%p240_p9)  ;;  %v397_v24 = vld [vmem:[%s1003_s5 + $0x30] sm:$0xff] (!%p240_p9)  ;;  %v398_v25 = vld [vmem:[%s1003_s5 + $0x38] sm:$0xff] (!%p240_p9)  ;;  %s561_s23 = sshll.u32 (!%p240_p9), %s267_s22, 3  ;;  %s485_s18 = scalar_lea.sflag (!%p240_p9), [#allocation3], %s267_s22 }
  0x11   : > { %643 = vmatprep.subr.bf16.mxu0 (!%p240_p9), %v778_v10  ;;  %648 = vmatpush3.bf16.msra.mxu1 (!%p240_p9), %v647_v18  ;;  %v653_v23 = vpack.c.bf16 (!%p240_p9), %v396_v22, %v395_v21  ;;  %v656_v26 = vpack.c.bf16 (!%p240_p9), %v398_v25, %v397_v24  ;;  %v399_v27 = vld [vmem:[%s1003_s5 + $0x40] sm:$0xff] (!%p240_p9)  ;;  %v400_v28 = vld [vmem:[%s1003_s5 + $0x48] sm:$0xff] (!%p240_p9)  ;;  %v401_v30 = vld [vmem:[%s1003_s5 + $0x50] sm:$0xff] (!%p240_p9) }
  0x12   : > { %649 = vmatprep.subr.bf16.mxu1 (!%p240_p9), %v778_v10  ;;  %v659_v29 = vpack.c.bf16 (!%p240_p9), %v400_v28, %v399_v27  ;;  %v402_v31 = vld [vmem:[%s1003_s5 + $0x58] sm:$0xff] (!%p240_p9)  ;;  %v403_v33 = vld [vmem:[%s1003_s5 + $0x60] sm:$0xff] (!%p240_p9)  ;;  %v404_v34 = vld [vmem:[%s1003_s5 + $0x68] sm:$0xff] (!%p240_p9) }
  0x13   : > { %v662_v32 = vpack.c.bf16 (!%p240_p9), %v402_v31, %v401_v30  ;;  %v665_v35 = vpack.c.bf16 (!%p240_p9), %v404_v34, %v403_v33  ;;  %v563_v40 = vld [vmem:[%s999_s1] ss:$0 sm:$0xff] (!%p240_p9)  ;;  %v405_v45 = vld [vmem:[%s1003_s5 + $0x70] sm:$0xff] (!%p240_p9)  ;;  %v406_v46 = vld [vmem:[%s1003_s5 + $0x78] sm:$0xff] (!%p240_p9) }
  0x14   : > { %645 = vmatpush3.bf16.msra.mxu0 (!%p240_p9), %v644_v14  ;;  %v564_v42 = vld [vmem:[%s1000_s2] ss:$0 sm:$0xff] (!%p240_p9)  ;;  %v668_v47 = vpack.c.bf16 (!%p240_p9), %v406_v46, %v405_v45 }
  0x15   : > { %s271_s13 = scalar_select %p270_p10, %s843_s28, 1  ;;  %651 = vmatpush3.bf16.msra.mxu1 %v650_v20  ;;  %v565_v48 = vld [vmem:[%s1002_s4] ss:$0 sm:$0xff] }
  0x16   : > { %652 = vmatprep.subr.bf16.mxu1 %v778_v10  ;;  %v567_v53 = vld [vmem:[%s1004_s6] ss:$0 sm:$0xff]  ;;  %s781_s28 = smov [#allocation2]  }
  0x17   : > { %s562_s14 = sshll.u32 %s271_s13, 3  ;;  %s269_s13 = scalar_lea.vmem [#allocation2], %s561_s23 }
  0x18   : > { %s273_s17 = scalar_lea.vmem %s998_s0, %s562_s14  ;;  %s498_s14 = sshll.u32 %s269_s13, 4  ;;  %s957_s14 = int_to_ptr.vmem [resolvable:$true] %s498_s14 }
  0x19   : > { %v274_v0 = vld [vmem:[%s273_s17] sm:$0xff]  ;;  %654 = vmatpush3.bf16.msra.mxu1 %v653_v23  ;;  %s955_s17 = scalar_lea.hbm %s1005_s7, %s569_s9  ;;  %s714_s19 = scalar_lea.vmem %s957_s14, 128 }
  0x1a   : > { %v276_v1 = vsel %vm275_vm0, %v274_v0, 0.0  ;;  %655 = vmatprep.subr.bf16.mxu1 %v778_v10  ;;  %p715_p11 = scmp.ne.s32.totalorder %s957_s14, %s714_s19  ;;  %s718_s20 = sshll.u32 %s781_s28, 4  ;;  %s719_s20 = int_to_ptr.vmem [resolvable:$false] %s718_s20 }
  0x1b   : > { %277 = vadd.xlane.f32.xlu0 %v276_v1  ;;  %s720_s21 = scalar_lea.vmem %s719_s20, 256  ;;  %p721_p0 = scmp.lt.s32.totalorder %s957_s14, %s719_s20 }
  0x1c   : > { %p716_p12 = pnand %p715_p11, %p860_p5  ;;  %p722_p1 = scmp.lt.s32.totalorder %s720_s21, %s714_s19 }
  0x1d   : > { %657 = vmatpush3.bf16.msra.mxu1 %v656_v26 }
  0x1e   : > { %658 = vmatprep.subr.bf16.mxu1 %v778_v10  ;;  %p717_p13 = pneg %p716_p12  ;;  %p723_p2 = por %p722_p1, %p721_p0 }
  0x20   : > { %p724_p3 = pnand %p723_p2, %p717_p13 }
  0x21   : > { %660 = vmatpush3.bf16.msra.mxu1 %v659_v29 }
  0x22   : > { %661 = vmatprep.subr.bf16.mxu1 %v778_v10 }
  0x25   : > { %663 = vmatpush3.bf16.msra.mxu1 %v662_v32 }
  0x26   : > { %664 = vmatprep.subr.bf16.mxu1 %v778_v10 }
  0x29   : > { %666 = vmatpush3.bf16.msra.mxu1 %v665_v35 }
  0x2a   : > { %667 = vmatprep.subr.bf16.mxu1 %v778_v10 }
  0x2d   : > { %669 = vmatpush3.bf16.msra.mxu1 %v668_v47 }
  0xa8   : > { %v278_v2 = vpop.xlane.xlu0 %277 }
  0xa9   : > { %v279_v3 = vmul.f32 0.03125, %v278_v2 }
  0xab   : > { %v280_v4 = vsub.f32 %v274_v0, %v279_v3 }
  0xad   : > { %v281_v5 = vmul.f32 %v280_v4, %v280_v4 }
  0xaf   : > { %v282_v6 = vsel %vm275_vm0, %v281_v5, 0.0 }
  0xb0   : > { %283 = vadd.xlane.f32.xlu0 %v282_v6 }
 0x13d   : > { %v284_v36 = vpop.xlane.xlu0 %283 }
 0x13e   : > { %v285_v37 = vmul.f32 0.03125, %v284_v36 }
 0x140   : > { %v286_v38 = vadd.f32 1e-05, %v285_v37 }
 0x142   : > { %712 = vrsqrt.f32 %v286_v38 }
 0x14c   : > { %v713_v39 = vpop.eup %712 }
 0x14d   : > { %v288_v41 = vmul.f32 %v713_v39, %v280_v4 }
 0x14f   : > { %v296_v43 = vmul.f32 %v563_v40, %v288_v41 }
 0x151   : > { %v304_v44 = vadd.f32 %v564_v42, %v296_v43 }
 0x153   : > { %603 = vmatmul.mubr.msk.f32.vlgmr.msra.gmra.mrb[0].mxu0 %vm275_vm0, %v304_v44 }
 0x226   : > { %v386_v49 = vpop.f32.mrb[0].mxu0 }
 0x227   : > { %v387_v50 = vadd.f32 %v565_v48, %v386_v49  ;;  %v604_v51 = vpop.f32.mrb[1].mxu0 }
 0x229   : > { %v390_v52 = vmax.f32 %v387_v50, 0.0 }
 0x22b   : > { %638 = vmatmul.mubr.f32.vlgmr.msra.gmra.mrb[0].mxu1 %v390_v52 }
 0x2fe   : > { %v479_v54 = vpop.f32.mrb[0].mxu1 }
 0x2ff   : > { %v480_v55 = vadd.f32 %v567_v53, %v479_v54  ;;  %v639_v56 = vpop.f32.mrb[1].mxu1 }
 0x301   : > { %483 = vst.msk [vmem:[%s269_s13] sm:$0xff] %vm275_vm0, %v480_v55 }
 0x302   : > { %727 = shalt.err (!%p724_p3)
}
 0x303   : > { %s728_s22 = scalar_lea.hbm %s955_s17, 128  ;;  %s732_s8 = scalar_lea.hbm %s1005_s7, 256 }
 0x304   : > { %p729_p4 = scmp.ne.s32.totalorder %s955_s17, %s728_s22  ;;  %p733_p9 = scmp.lt.u32.totalorder %s955_s17, %s1005_s7 }
 0x305   : > { %p734_p10 = scmp.lt.u32.totalorder %s732_s8, %s728_s22  ;;  %p736_p12 = scmp.lt.u32.totalorder %s728_s22, %s955_s17 }
 0x306   : > { %p730_p7 = pnand %p729_p4, %p860_p5 }
 0x307   : > { %p735_p11 = por %p734_p10, %p733_p9 }
 0x308   : > { %p731_p8 = pneg %p730_p7 }
 0x309   : > { %p737_p13 = por %p736_p12, %p735_p11 }
 0x30b   : > { %p738_p0 = pnand %p737_p13, %p731_p8 }
 0x30d   : > { %741 = shalt.err (!%p738_p0)
}
 0x30e   : > { %670 = dma.vmem_to_hbm [thread:$0]  (%p860_p5), %s957_s14, 128, %s955_s17, %s485_s18  }
 0x30f PF: > { %p676_p1 = scmp.ge.s32.totalorder %s776_s27, 2  ;;  %s510_s15 = sand.u32 1, %s764_s24  }
 0x310   : > { %s511_s16 = scalar_lea.sflag [#allocation3], %s510_s15 }
 0x311   : > { %p673_p2 = pnand %p676_p1, %p864_p6 }
 0x313   : > { %759 = dma.done.wait (!%p673_p2), %s511_s16, 128  }
 0x314   : > { %761 = vsyncadd (!%p673_p2), %s511_s16, 4294967168  ;;  %p17_p3 = scmp.ge.s32.totalorder %s847_s30, 4   ;;  %s1008_s24 = smov %s768_s25 }
 0x315   : > { %s1009_s25 = smov %s772_s26  ;;  %s1010_s26 = smov %s858_s10 }
 0x316   : > { %s1011_s27 = smov %s847_s30  ;;  %19 = sbr.rel (!%p17_p3) target bundleno = 3 (0x3), region = 83 }
 0x31d   :  { %516 = vsyncpa [#allocation3], 1 }
 0x31e   :  { %518 = vsyncpa [#allocation3 + $0x1], 1 }

</bundles_post_ra>
